<compile_context>
chip_gen: v7x
topology: tpu7x:2x2x1
jax: 0.10.0
libtpu: 0.0.40
codegen_flags: <defaults>
</compile_context>

<pallas_src>
import numpy as np
import jax
import jax.numpy as jnp
from jax.experimental import pallas as pl
from jax.experimental.pallas import tpu as pltpu


# ----------------------------- Pallas kernel ------------------------------- #

def cnn_fused_kernel(x_ref, wc_ref, bc_ref, w1a_ref, w2a_ref, w3a_ref, b3a_ref,
                     o_ref, h1_sc):
    """Fused forward for one lane-tile of the batch.

    x_ref  : (3, TN)     channels on sublanes, batch on lanes
    wc_ref : (3, 3)      conv1 weight [c_out, c_in]      bc_ref: (3, 1)
    w1a_ref: (240, 8)    lin1 block weights; col c = w1 for channel c,
                         col 3 = b1 (bias folded), cols 4:8 = 0
    w2a_ref: (180, 248)  block-diag lin2; col 240 = b2 (bias folded), 241:248 = 0
    w3a_ref: (12, 180)   block-diag lin3              b3a_ref: (12, 1)
    o_ref  : (12, TN)    row = channel*4 + out_feature, batch on lanes
    h1_sc  : (248, TN)   VMEM scratch: rows 0:240 = relu(lin1), row 240 = 1,
                         rows 241:248 = 0 (zero-padded contraction tail)
    """
    tn = x_ref.shape[1]
    x = x_ref[...]
    wc = wc_ref[...]
    bc = bc_ref[...]

    def conv_relu(z):
        # conv1 (kernel size 1) + ReLU.  K=3 contraction as unrolled VPU
        # broadcast-FMAs; an MXU push for K=3 would be <1% utilized.
        acc = wc[:, 0:1] * z[0:1, :]
        acc = acc + wc[:, 1:2] * z[1:2, :]
        acc = acc + wc[:, 2:3] * z[2:3, :]
        return jnp.maximum(acc + bc, 0.0)

    # conv1 -> relu -> pool (identity at L=1), applied twice.
    y = conv_relu(conv_relu(x))                                   # (3, TN)

    # lin1 (+ bias folded) on the MXU: A = [y0, y1, y2, 1, 0, 0, 0, 0].
    ones = jnp.ones((1, tn), jnp.float32)
    zeros4 = jnp.zeros((4, tn), jnp.float32)
    a1 = jnp.concatenate([y, ones, zeros4], axis=0)               # (8, TN)
    h1 = jnp.dot(w1a_ref[...], a1, preferred_element_type=jnp.float32)  # (240, TN)

    # Stage relu(lin1) plus the ones/zeros tail into VMEM so lin2's bias is
    # folded into the matmul (lane-dense, sublane-aligned stores).
    h1_sc[0:240, :] = jnp.maximum(h1, 0.0)
    ridx = jax.lax.broadcasted_iota(jnp.int32, (8, tn), 0)
    h1_sc[240:248, :] = jnp.where(ridx == 0, 1.0, 0.0).astype(jnp.float32)

    # lin2 (+ bias folded) block-diagonal on the MXU, ReLU on the VPU.
    h2 = jnp.maximum(
        jnp.dot(w2a_ref[...], h1_sc[...], preferred_element_type=jnp.float32),
        0.0)                                                      # (180, TN)

    # lin3 block-diagonal; bias is only 12 rows so a broadcast add is cheap.
    # Single contiguous (12, TN) lane-dense store.
    o_ref[...] = (jnp.dot(w3a_ref[...], h2, preferred_element_type=jnp.float32)
                  + b3a_ref[...])


# ------------------------------- Wrapper ----------------------------------- #

def _round_up(a, b):
    return (a + b - 1) // b * b


def cnn_forward(x, params):
    """x: (N, 3, 1) float32 -> (N, 3, 4) float32."""
    wc, bc, wl1, bl1, wl2, bl2, wl3, bl3 = params
    N, C, L = x.shape
    assert C == 3 and L == 1, \
        "forward requires 3 channels and L==1 (Linear(1,80) + pool-identity shortcut)"

    # ---- Augmented / block-diagonal weights (tiny; built in the jit graph) ----
    w1a = jnp.zeros((240, 8), jnp.float32)
    w2a = jnp.zeros((180, 248), jnp.float32)
    w3a = jnp.zeros((12, 180), jnp.float32)
    for c in range(3):
        w1a = w1a.at[80 * c:80 * (c + 1), c].set(wl1[:, 0])
        w1a = w1a.at[80 * c:80 * (c + 1), 3].set(bl1)            # lin1 bias folded
        w2a = w2a.at[60 * c:60 * (c + 1), 80 * c:80 * (c + 1)].set(wl2)
        w2a = w2a.at[60 * c:60 * (c + 1), 240].set(bl2)          # lin2 bias folded
        w3a = w3a.at[4 * c:4 * (c + 1), 60 * c:60 * (c + 1)].set(wl3)
    b3a = jnp.tile(bl3, 3).reshape(12, 1)

    # ---- Batch on lanes: (3, N), zero-padded to a 128-aligned lane tile ----
    # NOTE: this transpose and the final reshape/transpose are standalone XLA
    # HBM copies (~2x the kernel's own HBM traffic); callers that can consume
    # (3, N) in / (12, N) out should bypass them.
    x_t = jnp.transpose(x[:, :, 0])                              # (3, N)

    n128 = _round_up(N, 128)
    TN_MAX = 4096                                                # fits 32 MiB VMEM everywhere
    if n128 > TN_MAX:
        tn = TN_MAX                                              # >=2 grid steps
    elif n128 >= 2048 and n128 % 256 == 0:
        tn = n128 // 2                                           # give v7x's 2nd TC a step
    else:
        tn = n128                                                # single (small) step
    n_pad = _round_up(N, tn)
    if n_pad != N:
        x_t = jnp.pad(x_t, ((0, 0), (0, n_pad - N)))

    grid = (n_pad // tn,)
    const = lambda i: (0, 0)                                     # weights resident across steps

    out_t = pl.pallas_call(
        cnn_fused_kernel,
        out_shape=jax.ShapeDtypeStruct((12, n_pad), jnp.float32),
        grid=grid,
        in_specs=[
            pl.BlockSpec((3, tn), lambda i: (0, i)),             # x tile (batch on lanes)
            pl.BlockSpec((3, 3), const),                         # conv1 weight
            pl.BlockSpec((3, 1), const),                         # conv1 bias
            pl.BlockSpec((240, 8), const),                       # lin1 augmented weight
            pl.BlockSpec((180, 248), const),                     # lin2 block-diag + bias col
            pl.BlockSpec((12, 180), const),                      # lin3 block-diag
            pl.BlockSpec((12, 1), const),                        # lin3 bias
        ],
        out_specs=pl.BlockSpec((12, tn), lambda i: (0, i)),      # lane-dense output slab
        scratch_shapes=[pltpu.VMEM((248, tn), jnp.float32)],     # relu(lin1) + ones/zeros tail
        compiler_params=pltpu.CompilerParams(
            dimension_semantics=("parallel",),
            vmem_limit_bytes=32 * 1024 * 1024),
    )(
        x_t,
        wc, bc.reshape(3, 1),
        w1a, w2a, w3a, b3a,
    )

    out_t = out_t[:, :N]                                         # (12, N), drop lane padding
    # rows are channel*4 + feature; back to PyTorch's (N, C=3, out=4)
    return jnp.transpose(out_t.reshape(3, 4, N), (2, 0, 1))


# --------------------------- Parameter creation ----------------------------- #

def init_params(key):
    """Deterministic synthetic parameters matching the module's shapes.

    conv1: weight (3, 3, 1) -> stored squeezed as (3, 3); bias (3,)
    lin1:  (80, 1), (80,)    lin2: (60, 80), (60,)    lin3: (4, 60), (4,)
    (conv2 is unused in forward and therefore not created.)
    """
    ks = jax.random.split(key, 8)

    def u(k, shape, fan_in):
        bound = 1.0 / np.sqrt(fan_in)
        return jax.random.uniform(k, shape, jnp.float32, -bound, bound)

    wc = u(ks[0], (3, 3), 3)          # conv1 weight, kernel dim (size 1) squeezed
    bc = u(ks[1], (3,), 3)
    wl1 = u(ks[2], (80, 1), 1)
    bl1 = u(ks[3], (80,), 1)
    wl2 = u(ks[4], (60, 80), 80)
    bl2 = u(ks[5], (60,), 80)
    wl3 = u(ks[6], (4, 60), 60)
    bl3 = u(ks[7], (4,), 60)
    return (wc, bc, wl1, bl1, wl2, bl2, wl3, bl3)


def reference_forward(x, params):
    """Pure-JAX reference of the same forward pass (for correctness check)."""
    wc, bc, wl1, bl1, wl2, bl2, wl3, bl3 = params
    y = x[:, :, 0]                                           # (N, 3)
    y = jnp.maximum(y @ wc.T + bc, 0.0)                      # conv1 + relu (+pool id)
    y = jnp.maximum(y @ wc.T + bc, 0.0)                      # conv1 + relu (+pool id)
    h = jnp.maximum(y[..., None] * wl1[:, 0] + bl1, 0.0)     # (N, 3, 80)
    h = jnp.maximum(jnp.einsum('ncf,gf->ncg', h, wl2) + bl2, 0.0)   # (N, 3, 60)
    return jnp.einsum('ncg,jg->ncj', h, wl3) + bl3           # (N, 3, 4)


# --------------------------------- Main ------------------------------------- #

if __name__ == "__main__":
    key = jax.random.PRNGKey(0)
    k_param, k_x = jax.random.split(key)

    params = init_params(k_param)
    # Input: batch=2, channels=3, length=1 (length forced to 1 by Linear(1, 80)).
    x = jax.random.normal(k_x, (2, 3, 1), dtype=jnp.float32)

    fwd = jax.jit(cnn_forward)
    out = jax.block_until_ready(fwd(x, params))

    ref = reference_forward(x, params)
    np.testing.assert_allclose(np.asarray(out), np.asarray(ref), rtol=1e-5, atol=2e-5)
    assert out.shape == (2, 3, 4)

    print("KERNEL_OK")
</pallas_src>

<mosaic_0001>
module attributes {stable_mosaic.version = 11 : i64} {
  func.func @cnn_fused_kernel(%arg0: i32, %arg1: memref<3x128xf32, #tpu.memory_space<vmem>>, %arg2: memref<3x3xf32, #tpu.memory_space<vmem>>, %arg3: memref<3x1xf32, #tpu.memory_space<vmem>>, %arg4: memref<240x8xf32, #tpu.memory_space<vmem>>, %arg5: memref<180x248xf32, #tpu.memory_space<vmem>>, %arg6: memref<12x180xf32, #tpu.memory_space<vmem>>, %arg7: memref<12x1xf32, #tpu.memory_space<vmem>>, %arg8: memref<12x128xf32, #tpu.memory_space<vmem>>, %arg9: memref<248x128xf32, #tpu.memory_space<vmem>>) attributes {dimension_semantics = [#tpu.dimension_semantics<parallel>], iteration_bounds = array<i64: 1>, scalar_prefetch = 0 : i64, scratch_operands = 1 : i64, tpu.core_type = #tpu.core_type<tc>, window_params = [{transform_indices = @transform_0, window_bounds = array<i64: 3, 128>}, {pipeline_mode = #tpu.pipeline_mode<synchronous>, transform_indices = @transform_1, window_bounds = array<i64: 3, 3>}, {pipeline_mode = #tpu.pipeline_mode<synchronous>, transform_indices = @transform_2, window_bounds = array<i64: 3, 1>}, {pipeline_mode = #tpu.pipeline_mode<synchronous>, transform_indices = @transform_3, window_bounds = array<i64: 240, 8>}, {pipeline_mode = #tpu.pipeline_mode<synchronous>, transform_indices = @transform_4, window_bounds = array<i64: 180, 248>}, {pipeline_mode = #tpu.pipeline_mode<synchronous>, transform_indices = @transform_5, window_bounds = array<i64: 12, 180>}, {pipeline_mode = #tpu.pipeline_mode<synchronous>, transform_indices = @transform_6, window_bounds = array<i64: 12, 1>}, {transform_indices = @transform_7, window_bounds = array<i64: 12, 128>}]} {
    %c0 = arith.constant 0 : index
    %c0_0 = arith.constant 0 : index
    %0 = vector.load %arg1[%c0, %c0_0] : memref<3x128xf32, #tpu.memory_space<vmem>>, vector<3x128xf32>
    %c0_1 = arith.constant 0 : index
    %c0_2 = arith.constant 0 : index
    %1 = vector.load %arg2[%c0_1, %c0_2] : memref<3x3xf32, #tpu.memory_space<vmem>>, vector<3x3xf32>
    %c0_3 = arith.constant 0 : index
    %c0_4 = arith.constant 0 : index
    %2 = vector.load %arg3[%c0_3, %c0_4] : memref<3x1xf32, #tpu.memory_space<vmem>>, vector<3x1xf32>
    %3 = vector.extract_strided_slice %1 {offsets = [0, 0], sizes = [3, 1], strides = [1, 1]} : vector<3x3xf32> to vector<3x1xf32>
    %4 = vector.extract_strided_slice %0 {offsets = [0, 0], sizes = [1, 128], strides = [1, 1]} : vector<3x128xf32> to vector<1x128xf32>
    %5 = vector.broadcast %3 : vector<3x1xf32> to vector<3x128xf32>
    %6 = vector.broadcast %4 : vector<1x128xf32> to vector<3x128xf32>
    %7 = arith.mulf %5, %6 : vector<3x128xf32>
    %8 = vector.extract_strided_slice %1 {offsets = [0, 1], sizes = [3, 1], strides = [1, 1]} : vector<3x3xf32> to vector<3x1xf32>
    %9 = vector.extract_strided_slice %0 {offsets = [1, 0], sizes = [1, 128], strides = [1, 1]} : vector<3x128xf32> to vector<1x128xf32>
    %10 = vector.broadcast %8 : vector<3x1xf32> to vector<3x128xf32>
    %11 = vector.broadcast %9 : vector<1x128xf32> to vector<3x128xf32>
    %12 = arith.mulf %10, %11 : vector<3x128xf32>
    %13 = arith.addf %7, %12 : vector<3x128xf32>
    %14 = vector.extract_strided_slice %1 {offsets = [0, 2], sizes = [3, 1], strides = [1, 1]} : vector<3x3xf32> to vector<3x1xf32>
    %15 = vector.extract_strided_slice %0 {offsets = [2, 0], sizes = [1, 128], strides = [1, 1]} : vector<3x128xf32> to vector<1x128xf32>
    %16 = vector.broadcast %14 : vector<3x1xf32> to vector<3x128xf32>
    %17 = vector.broadcast %15 : vector<1x128xf32> to vector<3x128xf32>
    %18 = arith.mulf %16, %17 : vector<3x128xf32>
    %19 = arith.addf %13, %18 : vector<3x128xf32>
    %20 = vector.broadcast %2 : vector<3x1xf32> to vector<3x128xf32>
    %21 = arith.addf %19, %20 : vector<3x128xf32>
    %cst = arith.constant 0.000000e+00 : f32
    %22 = vector.broadcast %cst : f32 to vector<3x128xf32>
    %23 = arith.maximumf %21, %22 : vector<3x128xf32>
    %24 = vector.extract_strided_slice %1 {offsets = [0, 0], sizes = [3, 1], strides = [1, 1]} : vector<3x3xf32> to vector<3x1xf32>
    %25 = vector.extract_strided_slice %23 {offsets = [0, 0], sizes = [1, 128], strides = [1, 1]} : vector<3x128xf32> to vector<1x128xf32>
    %26 = vector.broadcast %24 : vector<3x1xf32> to vector<3x128xf32>
    %27 = vector.broadcast %25 : vector<1x128xf32> to vector<3x128xf32>
    %28 = arith.mulf %26, %27 : vector<3x128xf32>
    %29 = vector.extract_strided_slice %1 {offsets = [0, 1], sizes = [3, 1], strides = [1, 1]} : vector<3x3xf32> to vector<3x1xf32>
    %30 = vector.extract_strided_slice %23 {offsets = [1, 0], sizes = [1, 128], strides = [1, 1]} : vector<3x128xf32> to vector<1x128xf32>
    %31 = vector.broadcast %29 : vector<3x1xf32> to vector<3x128xf32>
    %32 = vector.broadcast %30 : vector<1x128xf32> to vector<3x128xf32>
    %33 = arith.mulf %31, %32 : vector<3x128xf32>
    %34 = arith.addf %28, %33 : vector<3x128xf32>
    %35 = vector.extract_strided_slice %1 {offsets = [0, 2], sizes = [3, 1], strides = [1, 1]} : vector<3x3xf32> to vector<3x1xf32>
    %36 = vector.extract_strided_slice %23 {offsets = [2, 0], sizes = [1, 128], strides = [1, 1]} : vector<3x128xf32> to vector<1x128xf32>
    %37 = vector.broadcast %35 : vector<3x1xf32> to vector<3x128xf32>
    %38 = vector.broadcast %36 : vector<1x128xf32> to vector<3x128xf32>
    %39 = arith.mulf %37, %38 : vector<3x128xf32>
    %40 = arith.addf %34, %39 : vector<3x128xf32>
    %41 = vector.broadcast %2 : vector<3x1xf32> to vector<3x128xf32>
    %42 = arith.addf %40, %41 : vector<3x128xf32>
    %cst_5 = arith.constant 0.000000e+00 : f32
    %43 = vector.broadcast %cst_5 : f32 to vector<3x128xf32>
    %44 = arith.maximumf %42, %43 : vector<3x128xf32>
    %cst_6 = arith.constant 1.000000e+00 : f32
    %45 = vector.broadcast %cst_6 : f32 to vector<1x128xf32>
    %cst_7 = arith.constant 0.000000e+00 : f32
    %46 = vector.broadcast %cst_7 : f32 to vector<4x128xf32>
    %47 = tpu.concatenate %44, %45, %46 in 0 : vector<3x128xf32>, vector<1x128xf32>, vector<4x128xf32> -> vector<8x128xf32>
    %c0_8 = arith.constant 0 : index
    %c0_9 = arith.constant 0 : index
    %48 = vector.load %arg4[%c0_8, %c0_9] : memref<240x8xf32, #tpu.memory_space<vmem>>, vector<240x8xf32>
    %cst_10 = arith.constant dense<0.000000e+00> : vector<240x128xf32>
    %49 = tpu.matmul %48, %47, %cst_10 {dimension_numbers = #tpu.dot_dimension_numbers<[1], [0], [0], [1], [0, 0, 1, 1], [], []>} : vector<240x8xf32>, vector<8x128xf32>, vector<240x128xf32> -> vector<240x128xf32>
    %cst_11 = arith.constant 0.000000e+00 : f32
    %50 = vector.broadcast %cst_11 : f32 to vector<240x128xf32>
    %51 = arith.maximumf %49, %50 : vector<240x128xf32>
    %c0_12 = arith.constant 0 : index
    %c0_13 = arith.constant 0 : index
    %52 = vector.load %arg9[%c0_12, %c0_13] : memref<248x128xf32, #tpu.memory_space<vmem>>, vector<240x128xf32>
    tpu.vector_store %arg9[%c0_12, %c0_13], %51 {strides = array<i32>} : memref<248x128xf32, #tpu.memory_space<vmem>>, vector<240x128xf32>,
    %53 = tpu.iota {dimensions = array<i32: 0>} : vector<8x128xi32>
    %c0_i32 = arith.constant 0 : i32
    %54 = vector.broadcast %c0_i32 : i32 to vector<8x128xi32>
    %55 = arith.cmpi eq, %53, %54 : vector<8x128xi32>
    %cst_14 = arith.constant 1.000000e+00 : f32
    %cst_15 = arith.constant 0.000000e+00 : f32
    %56 = vector.broadcast %cst_14 : f32 to vector<8x128xf32>
    %57 = vector.broadcast %cst_15 : f32 to vector<8x128xf32>
    %58 = arith.select %55, %56, %57 : vector<8x128xi1>, vector<8x128xf32>
    %c240 = arith.constant 240 : index
    %c0_16 = arith.constant 0 : index
    %59 = vector.load %arg9[%c240, %c0_16] : memref<248x128xf32, #tpu.memory_space<vmem>>, vector<8x128xf32>
    tpu.vector_store %arg9[%c240, %c0_16], %58 {strides = array<i32>} : memref<248x128xf32, #tpu.memory_space<vmem>>, vector<8x128xf32>,
    %c0_17 = arith.constant 0 : index
    %c0_18 = arith.constant 0 : index
    %60 = vector.load %arg5[%c0_17, %c0_18] : memref<180x248xf32, #tpu.memory_space<vmem>>, vector<180x248xf32>
    %c0_19 = arith.constant 0 : index
    %c0_20 = arith.constant 0 : index
    %61 = vector.load %arg9[%c0_19, %c0_20] : memref<248x128xf32, #tpu.memory_space<vmem>>, vector<248x128xf32>
    %cst_21 = arith.constant dense<0.000000e+00> : vector<180x128xf32>
    %62 = tpu.matmul %60, %61, %cst_21 {dimension_numbers = #tpu.dot_dimension_numbers<[1], [0], [0], [1], [0, 0, 1, 1], [], []>} : vector<180x248xf32>, vector<248x128xf32>, vector<180x128xf32> -> vector<180x128xf32>
    %cst_22 = arith.constant 0.000000e+00 : f32
    %63 = vector.broadcast %cst_22 : f32 to vector<180x128xf32>
    %64 = arith.maximumf %62, %63 : vector<180x128xf32>
    %c0_23 = arith.constant 0 : index
    %c0_24 = arith.constant 0 : index
    %65 = vector.load %arg6[%c0_23, %c0_24] : memref<12x180xf32, #tpu.memory_space<vmem>>, vector<12x180xf32>
    %cst_25 = arith.constant dense<0.000000e+00> : vector<12x128xf32>
    %66 = tpu.matmul %65, %64, %cst_25 {dimension_numbers = #tpu.dot_dimension_numbers<[1], [0], [0], [1], [0, 0, 1, 1], [], []>} : vector<12x180xf32>, vector<180x128xf32>, vector<12x128xf32> -> vector<12x128xf32>
    %c0_26 = arith.constant 0 : index
    %c0_27 = arith.constant 0 : index
    %67 = vector.load %arg7[%c0_26, %c0_27] : memref<12x1xf32, #tpu.memory_space<vmem>>, vector<12x1xf32>
    %68 = vector.broadcast %67 : vector<12x1xf32> to vector<12x128xf32>
    %69 = arith.addf %66, %68 : vector<12x128xf32>
    %c0_28 = arith.constant 0 : index
    %c0_29 = arith.constant 0 : index
    %70 = vector.load %arg8[%c0_28, %c0_29] : memref<12x128xf32, #tpu.memory_space<vmem>>, vector<12x128xf32>
    tpu.vector_store %arg8[%c0_28, %c0_29], %69 {strides = array<i32>} : memref<12x128xf32, #tpu.memory_space<vmem>>, vector<12x128xf32>,
    return
  }
  func.func @transform_0(%arg0: i32) -> (i32, i32) {
    %c0_i32 = arith.constant 0 : i32
    %c0_i32_0 = arith.constant 0 : i32
    return %c0_i32, %arg0 : i32, i32
  }
  func.func @transform_1(%arg0: i32) -> (i32, i32) {
    %c0_i32 = arith.constant 0 : i32
    %c0_i32_0 = arith.constant 0 : i32
    %c0_i32_1 = arith.constant 0 : i32
    return %c0_i32, %c0_i32_0 : i32, i32
  }
  func.func @transform_2(%arg0: i32) -> (i32, i32) {
    %c0_i32 = arith.constant 0 : i32
    %c0_i32_0 = arith.constant 0 : i32
    %c0_i32_1 = arith.constant 0 : i32
    return %c0_i32, %c0_i32_0 : i32, i32
  }
  func.func @transform_3(%arg0: i32) -> (i32, i32) {
    %c0_i32 = arith.constant 0 : i32
    %c0_i32_0 = arith.constant 0 : i32
    %c0_i32_1 = arith.constant 0 : i32
    return %c0_i32, %c0_i32_0 : i32, i32
  }
  func.func @transform_4(%arg0: i32) -> (i32, i32) {
    %c0_i32 = arith.constant 0 : i32
    %c0_i32_0 = arith.constant 0 : i32
    %c0_i32_1 = arith.constant 0 : i32
    return %c0_i32, %c0_i32_0 : i32, i32
  }
  func.func @transform_5(%arg0: i32) -> (i32, i32) {
    %c0_i32 = arith.constant 0 : i32
    %c0_i32_0 = arith.constant 0 : i32
    %c0_i32_1 = arith.constant 0 : i32
    return %c0_i32, %c0_i32_0 : i32, i32
  }
  func.func @transform_6(%arg0: i32) -> (i32, i32) {
    %c0_i32 = arith.constant 0 : i32
    %c0_i32_0 = arith.constant 0 : i32
    %c0_i32_1 = arith.constant 0 : i32
    return %c0_i32, %c0_i32_0 : i32, i32
  }
  func.func @transform_7(%arg0: i32) -> (i32, i32) {
    %c0_i32 = arith.constant 0 : i32
    %c0_i32_0 = arith.constant 0 : i32
    return %c0_i32, %arg0 : i32, i32
  }
}

</mosaic_0001>

<bundles_post_ra>
// kernel: tile.8
= control target key start
LH: loop header
LB: loop body
LE: loop exit
PB: predicated region body
PF: predicated region fallthrough
CT: control target
= control target key end

     0   :  { %s22_s0 = inlined_call_operand.vmem [shape: f32[4], index: 0, kind: input, shape index: {}]   ;;  %s23_s1 = inlined_call_operand.vmem [shape: f32[3,4], index: 1, kind: output, shape index: {}]  }
   0x1   :  { %v4_v0 = vld [vmem:[%s22_s0] ss:$0 sm:$0xff] }
   0x2   :  { %5 = vst [vmem:[%s23_s1] sm:$0xf] %v4_v0 }

// kernel: tile.0
= control target key start
LH: loop header
LB: loop body
LE: loop exit
PB: predicated region body
PF: predicated region fallthrough
CT: control target
= control target key end

     0   :  { %s34_s8 = smov 125   ;;  %vm7_vm0 = vcmask 7168   ;;  %s35_s11 = smov 126   ;;  %s61_s0 = inlined_call_operand.vmem [shape: f32[3,4], index: 0, kind: input, shape index: {}]   ;;  %s62_s1 = inlined_call_operand.vmem [shape: f32[12,1], index: 1, kind: output, shape index: {}]  }
   0x1   :  { %v4_v0 = vld [vmem:[%s61_s0] sm:$0xf]  ;;  %s33_s0 = smov 127  }
   0x2   :  { %5 = vst [vmem:[#allocation0] sm:$0xf] %v4_v0 }
   0x9   :  { %v9_v1 = vld [vmem:[#allocation0] sm:$0x7]  }
   0xa   :  { %v21_v2 = vld [vmem:[#allocation0] sm:$0x7]   ;;  %10 = vrot.lane.b32.xlu0 %v9_v1, %s33_s0 }
   0xb   :  { %22 = vrot.lane.b32.xlu1 %v21_v2, %s34_s8  ;;  %v6_v3 = vld [vmem:[#allocation0] sm:$0x7]  }
   0xc   :  { %v15_v4 = vld [vmem:[#allocation0] sm:$0x7]   ;;  %8 = vst.msk [vmem:[%s62_s1] ss:$4 sm:$0x7] %vm7_vm0, %v6_v3  }
   0xe   :  { %16 = vrot.lane.b32.xlu0 %v15_v4, %s35_s11 }
  0x7c   :  { %v11_v5 = vpop.permute.xlu0 %10  }
  0x7d   :  { %v23_v6 = vpop.permute.xlu1 %22   ;;  %27 = vst.msk [vmem:[%s62_s1 + $0x1] ss:$4 sm:$0x7] %vm7_vm0, %v11_v5  }
  0x7e   :  { %29 = vst.msk [vmem:[%s62_s1 + $0x3] ss:$4 sm:$0x7] %vm7_vm0, %v23_v6  }
  0x80   :  { %v17_v7 = vpop.permute.xlu0 %16  }
  0x81   :  { %28 = vst.msk [vmem:[%s62_s1 + $0x2] ss:$4 sm:$0x7] %vm7_vm0, %v17_v7  }

// kernel: cnn_forward.1
= control target key start
LH: loop header
LB: loop body
LE: loop exit
PB: predicated region body
PF: predicated region fallthrough
CT: control target
= control target key end

     0   :  { %v1172_v0 = vmov 0   ;;  %v1173_v2 = vmov 2   ;;  %v1174_v4 = vmov 1   ;;  %vm119_vm0 = vcmask 64512   ;;  %s1571_s1 = inlined_call_operand.vmem [shape: f32[3,3], index: 1, kind: input, shape index: {}]   ;;  %s1572_s2 = inlined_call_operand.vmem [shape: f32[3,1], index: 2, kind: input, shape index: {}]   ;;  %s1573_s6 = inlined_call_operand.vmem [shape: f32[12,1], index: 6, kind: input, shape index: {}]   ;;  %s1574_s3 = inlined_call_operand.vmem [shape: f32[240,8], index: 3, kind: input, shape index: {}]   ;;  %s1575_s0 = inlined_call_operand.vmem [shape: f32[3,128], index: 0, kind: input, shape index: {}]   ;;  %s1576_s4 = inlined_call_operand.vmem [shape: f32[180,248], index: 4, kind: input, shape index: {}]   ;;  %s1577_s5 = inlined_call_operand.vmem [shape: f32[12,180], index: 5, kind: input, shape index: {}]   ;;  %s1578_s7 = inlined_call_operand.vmem [shape: f32[12,128], index: 7, kind: output, shape index: {}]  }
   0x1   :  { %1167 = vset.pattern.permute.xlu0 %v1172_v0  ;;  %v27_v1 = vld [vmem:[%s1571_s1] sm:$0x7]  ;;  %1169 = vset.pattern.permute.xlu1 %v1173_v2  ;;  %v34_v7 = vlaneseq  ;;  %vm85_vm1 = vcmask 1042432   ;;  %vm87_vm2 = vcmask 1043456   ;;  %v90_v38 = vld [vmem:[%s1574_s3 + $0x8] sm:$0xff]  ;;  %v91_v39 = vld [vmem:[%s1574_s3 + $0x10] sm:$0xff] }
   0x2   :  { %31 = vperm.xlu0 %1167, %v27_v1   ;;  %50 = vperm.xlu1 %1169, %v27_v1   ;;  %v28_v3 = vld [vmem:[%s1572_s2] sm:$0x7]  ;;  %v92_v40 = vld [vmem:[%s1574_s3 + $0x18] sm:$0xff]  ;;  %v94_v42 = vld [vmem:[%s1574_s3 + $0x28] sm:$0xff]  ;;  %vm567_vm3 = vcmask 982016   ;;  %vm856_vm5 = vcmask 424960  }
   0x3   :  { %v844_v5 = vld [vmem:[%s1573_s6] sm:$0xff]  ;;  %v1231_v8 = vshrl.u32 %v34_v7, 7  ;;  %v95_v43 = vld [vmem:[%s1574_s3 + $0x30] sm:$0xff]  ;;  %v96_v44 = vld [vmem:[%s1574_s3 + $0x38] sm:$0xff] }
   0x4   :  { %v89_v6 = vld [vmem:[%s1574_s3] sm:$0xff]  ;;  %v98_v46 = vld [vmem:[%s1574_s3 + $0x48] sm:$0xff]  ;;  %v99_v47 = vld [vmem:[%s1574_s3 + $0x50] sm:$0xff] }
   0x5   :  { %1038 = vmatprep.mubr.msk.f32.mxu0 %vm119_vm0, %v89_v6  ;;  %v36_v9 = vsub.s32 0, %v1231_v8  ;;  %v55_v10 = vsub.s32 2, %v1231_v8  ;;  %v45_v11 = vsub.s32 1, %v1231_v8  ;;  %v26_v12 = vld [vmem:[%s1575_s0] sm:$0x7]  ;;  %v100_v48 = vld [vmem:[%s1574_s3 + $0x58] sm:$0xff] }
   0x6   :  { %1168 = vset.pattern.permute.xlu0 %v1174_v4  ;;  %1170 = vset.pattern.permute.xlu1 %v1172_v0  ;;  %v93_v41 = vld [vmem:[%s1574_s3 + $0x20] sm:$0xff]  ;;  %v102_v50 = vld [vmem:[%s1574_s3 + $0x68] sm:$0xff]  ;;  %v103_v51 = vld [vmem:[%s1574_s3 + $0x70] sm:$0xff]  ;;  %vm487_vm4 = vcmp.eq.s32.totalorder %v1231_v8, 0 }
   0x7   :  { %40 = vperm.xlu0 %1168, %v27_v1   ;;  %61 = vperm.xlu1 %1170, %v28_v3   ;;  %v37_v14 = vrot.slane %v26_v12, %v36_v9  ;;  %v56_v15 = vrot.slane %v26_v12, %v55_v10  ;;  %v46_v16 = vrot.slane %v26_v12, %v45_v11  ;;  %v97_v45 = vld [vmem:[%s1574_s3 + $0x40] sm:$0xff]  ;;  %v104_v52 = vld [vmem:[%s1574_s3 + $0x78] sm:$0xff]  ;;  %v106_v54 = vld [vmem:[%s1574_s3 + $0x88] sm:$0xff]  ;;  %v1175_v3 = vmov 0.0|0.0  }
   0x8   :  { %v101_v49 = vld [vmem:[%s1574_s3 + $0x60] sm:$0xff]  ;;  %v107_v55 = vld [vmem:[%s1574_s3 + $0x90] sm:$0xff]  ;;  %v108_v56 = vld [vmem:[%s1574_s3 + $0x98] sm:$0xff]  ;;  %1083 = vmatprep.subr.bf16.mxu1 %v1175_v3 }
   0x9   :  { %v105_v53 = vld [vmem:[%s1574_s3 + $0x80] sm:$0xff]  ;;  %v110_v58 = vld [vmem:[%s1574_s3 + $0xa8] sm:$0xff]  ;;  %v111_v59 = vld [vmem:[%s1574_s3 + $0xb0] sm:$0xff] }
   0xa   :  { %v109_v57 = vld [vmem:[%s1574_s3 + $0xa0] sm:$0xff]  ;;  %v112_v60 = vld [vmem:[%s1574_s3 + $0xb8] sm:$0xff]  ;;  %v114_v62 = vld [vmem:[%s1574_s3 + $0xc8] sm:$0xff] }
   0xb   :  { %848 = vperm.xlu1 %1170, %v844_v5   ;;  %1171 = vset.pattern.permute.xlu0 %v1172_v0  ;;  %v113_v61 = vld [vmem:[%s1574_s3 + $0xc0] sm:$0xff]  ;;  %v115_v63 = vld [vmem:[%s1574_s3 + $0xd0] sm:$0xff]  ;;  %v116_v0 = vld [vmem:[%s1574_s3 + $0xd8] sm:$0xff] }
   0xc   :  { %v117_v1 = vld [vmem:[%s1574_s3 + $0xe0] sm:$0xff]  ;;  %v118_v2 = vld [vmem:[%s1574_s3 + $0xe8] sm:$0xff] }
   0xd   :  { %v491_v4 = vld [vmem:[%s1576_s4 + $0x8] sm:$0xff] }
   0xe   :  { %978 = vmatprep.mubr.msk.f32.mxu1 %vm567_vm3, %v491_v4  ;;  %v495_v8 = vld [vmem:[%s1576_s4 + $0x28] sm:$0xff] }
  0x81   :  { %v32_v13 = vpop.permute.xlu0 %31  ;;  %v51_v17 = vpop.permute.xlu1 %50 }
  0x82   :  { %v38_v19 = vmul.f32 %v37_v14, %v32_v13  ;;  %v57_v20 = vmul.f32 %v56_v15, %v51_v17 }
  0x86   :  { %v41_v18 = vpop.permute.xlu0 %40  ;;  %v62_v24 = vpop.permute.xlu1 %61 }
  0x87   :  { %v47_v21 = vmul.f32 %v46_v16, %v41_v18 }
  0x89   :  { %v48_v22 = vadd.f32 %v47_v21, %v38_v19 }
  0x8b   :  { %v58_v23 = vadd.f32 %v57_v20, %v48_v22 }
  0x8d   :  { %v64_v25 = vadd.f32 %v62_v24, %v58_v23 }
  0x8f   :  { %v65_v26 = vmax.f32 %v64_v25, 0.0 }
  0x91   :  { %v69_v27 = vrot.slane %v65_v26, %v36_v9  ;;  %v74_v28 = vrot.slane %v65_v26, %v45_v11  ;;  %v80_v29 = vrot.slane %v65_v26, %v55_v10 }
  0x93   :  { %v70_v30 = vmul.f32 %v69_v27, %v32_v13  ;;  %v75_v31 = vmul.f32 %v74_v28, %v41_v18  ;;  %v81_v33 = vmul.f32 %v80_v29, %v51_v17 }
  0x95   :  { %v76_v32 = vadd.f32 %v75_v31, %v70_v30 }
  0x97   :  { %v82_v34 = vadd.f32 %v81_v33, %v76_v32 }
  0x99   :  { %v83_v35 = vadd.f32 %v82_v34, %v62_v24 }
  0x9b   :  { %v84_v36 = vmax.f32 %v83_v35, 0.0 }
  0x9d   :  { %v86_v37 = vsel %vm85_vm1, %v84_v36, 1.0 }
  0x9e   :  { %1036 = vmatprep.subr.msk.mxu0 %vm87_vm2, %v86_v37 }
  0x9f   :  { %1037 = vmatpush3.msk.msra.mxu0 %vm87_vm2, %v86_v37 }
  0xa0   :  { %1039 = vmatmul.mubr.msk.f32.vlgmr.msra.gmra.mrb[0].mxu0 %vm119_vm0, %v90_v38  ;;  %1128 = vmatprep.subr.bf16.mxu0 %v1175_v3 }
  0xa1   :  { %1041 = vmatprep.mubr.msk.f32.mxu0 %vm119_vm0, %v91_v39 }
  0xa4   :  { %1042 = vmatmul.mubr.msk.f32.gmra.mrb[2].mxu0 %vm119_vm0, %v92_v40 }
  0xa5   :  { %1044 = vmatprep.mubr.msk.f32.mxu0 %vm119_vm0, %v93_v41 }
  0xa8   :  { %1045 = vmatmul.mubr.msk.f32.gmra.mrb[4].mxu0 %vm119_vm0, %v94_v42 }
  0xa9   :  { %1047 = vmatprep.mubr.msk.f32.mxu0 %vm119_vm0, %v95_v43 }
  0xac   :  { %1048 = vmatmul.mubr.msk.f32.gmra.mrb[6].mxu0 %vm119_vm0, %v96_v44 }
  0xad   :  { %1050 = vmatprep.mubr.msk.f32.mxu0 %vm119_vm0, %v97_v45 }
  0xb0   :  { %1051 = vmatmul.mubr.msk.f32.gmra.mrb[8].mxu0 %vm119_vm0, %v98_v46 }
  0xb1   :  { %1053 = vmatprep.mubr.msk.f32.mxu0 %vm119_vm0, %v99_v47 }
  0xb4   :  { %1054 = vmatmul.mubr.msk.f32.gmra.mrb[10].mxu0 %vm119_vm0, %v100_v48 }
  0xb5   :  { %1056 = vmatprep.mubr.msk.f32.mxu0 %vm119_vm0, %v101_v49 }
  0xb8   :  { %1057 = vmatmul.mubr.msk.f32.gmra.mrb[12].mxu0 %vm119_vm0, %v102_v50 }
  0xb9   :  { %1059 = vmatprep.mubr.msk.f32.mxu0 %vm119_vm0, %v103_v51 }
  0xbc   :  { %1060 = vmatmul.mubr.msk.f32.gmra.mrb[14].mxu0 %vm119_vm0, %v104_v52 }
  0xbd   :  { %1062 = vmatprep.mubr.msk.f32.mxu0 %vm119_vm0, %v105_v53 }
  0xc0   :  { %1063 = vmatmul.mubr.msk.f32.gmra.mrb[16].mxu0 %vm119_vm0, %v106_v54 }
  0xc1   :  { %1065 = vmatprep.mubr.msk.f32.mxu0 %vm119_vm0, %v107_v55 }
  0xc4   :  { %1066 = vmatmul.mubr.msk.f32.gmra.mrb[18].mxu0 %vm119_vm0, %v108_v56 }
  0xc5   :  { %1068 = vmatprep.mubr.msk.f32.mxu0 %vm119_vm0, %v109_v57 }
  0xc8   :  { %1069 = vmatmul.mubr.msk.f32.gmra.mrb[20].mxu0 %vm119_vm0, %v110_v58 }
  0xc9   :  { %1071 = vmatprep.mubr.msk.f32.mxu0 %vm119_vm0, %v111_v59 }
  0xcc   :  { %1072 = vmatmul.mubr.msk.f32.gmra.mrb[22].mxu0 %vm119_vm0, %v112_v60 }
  0xcd   :  { %1074 = vmatprep.mubr.msk.f32.mxu0 %vm119_vm0, %v113_v61 }
  0xd0   :  { %1075 = vmatmul.mubr.msk.f32.gmra.mrb[24].mxu0 %vm119_vm0, %v114_v62 }
  0xd1   :  { %1077 = vmatprep.mubr.msk.f32.mxu0 %vm119_vm0, %v115_v63 }
  0xd4   :  { %1078 = vmatmul.mubr.msk.f32.gmra.mrb[26].mxu0 %vm119_vm0, %v116_v0 }
  0xd5   :  { %1080 = vmatprep.mubr.msk.f32.mxu0 %vm119_vm0, %v117_v1 }
  0xd8   :  { %1081 = vmatmul.mubr.msk.f32.gmra.mrb[28].mxu0 %vm119_vm0, %v118_v2 }
 0x173   :  { %v1040_v5 = vpop.f32.mrb[0].mxu0 }
 0x174   :  { %v426_v6 = vmax.f32 %v1040_v5, 0.0  ;;  %v276_v7 = vpop.f32.mrb[1].mxu0 }
 0x175   :  { %v425_v9 = vmax.f32 %v276_v7, 0.0 }
 0x177   :  { %v1043_v10 = vpop.f32.mrb[2].mxu0  ;;  %v1084_v11 = vpack.c.bf16 %v426_v6, %v425_v9 }
 0x178   :  { %v428_v12 = vmax.f32 %v1043_v10, 0.0  ;;  %v286_v13 = vpop.f32.mrb[3].mxu0 }
 0x179   :  { %v427_v14 = vmax.f32 %v286_v13, 0.0  ;;  %1085 = vmatpush1.bf16.msra.mxu1 %v1084_v11 }
 0x17a   :  { %1086 = vmatprep.subr.bf16.mxu1 %v1175_v3 }
 0x17b   :  { %v1087_v15 = vpack.c.bf16 %v428_v12, %v427_v14  ;;  %v1046_v16 = vpop.f32.mrb[4].mxu0 }
 0x17c   :  { %v430_v17 = vmax.f32 %v1046_v16, 0.0  ;;  %v296_v18 = vpop.f32.mrb[5].mxu0 }
 0x17d   :  { %v429_v19 = vmax.f32 %v296_v18, 0.0  ;;  %1088 = vmatpush1.bf16.msra.mxu1 %v1087_v15 }
 0x17e   :  { %1089 = vmatprep.subr.bf16.mxu1 %v1175_v3 }
 0x17f   :  { %v1090_v20 = vpack.c.bf16 %v430_v17, %v429_v19  ;;  %v1049_v21 = vpop.f32.mrb[6].mxu0  ;;  %v1176_v19 = vmov 0.0  }
 0x180   :  { %v432_v22 = vmax.f32 %v1049_v21, 0.0  ;;  %v306_v23 = vpop.f32.mrb[7].mxu0  ;;  %v493_v21 = vld [vmem:[%s1576_s4 + $0x18] sm:$0xff] }
 0x181   :  { %v431_v24 = vmax.f32 %v306_v23, 0.0  ;;  %1091 = vmatpush1.bf16.msra.mxu1 %v1090_v20  ;;  %v490_v20 = vld [vmem:[%s1576_s4] sm:$0xff]  ;;  %v492_v23 = vld [vmem:[%s1576_s4 + $0x10] sm:$0xff] }
 0x182   :  { %1092 = vmatprep.subr.bf16.mxu1 %v1175_v3 }
 0x183   :  { %v1093_v25 = vpack.c.bf16 %v432_v22, %v431_v24  ;;  %v1052_v26 = vpop.f32.mrb[8].mxu0  ;;  %v1177_v22 = vmov 1.0   ;;  %v494_v24 = vld [vmem:[%s1576_s4 + $0x20] sm:$0xff] }
 0x184   :  { %v434_v27 = vmax.f32 %v1052_v26, 0.0  ;;  %v316_v28 = vpop.f32.mrb[9].mxu0  ;;  %v496_v26 = vld [vmem:[%s1576_s4 + $0x30] sm:$0xff] }
 0x185   :  { %v433_v29 = vmax.f32 %v316_v28, 0.0  ;;  %1094 = vmatpush1.bf16.msra.mxu1 %v1093_v25  ;;  %v497_v25 = vld [vmem:[%s1576_s4 + $0x38] sm:$0xff]  ;;  %v498_v28 = vld [vmem:[%s1576_s4 + $0x40] sm:$0xff] }
 0x186   :  { %1095 = vmatprep.subr.bf16.mxu1 %v1175_v3 }
 0x187   :  { %v1096_v30 = vpack.c.bf16 %v434_v27, %v433_v29  ;;  %v1055_v31 = vpop.f32.mrb[10].mxu0  ;;  %v499_v27 = vld [vmem:[%s1576_s4 + $0x48] sm:$0xff]  ;;  %v501_v29 = vld [vmem:[%s1576_s4 + $0x58] sm:$0xff] }
 0x188   :  { %v436_v32 = vmax.f32 %v1055_v31, 0.0  ;;  %v326_v33 = vpop.f32.mrb[11].mxu0  ;;  %v503_v31 = vld [vmem:[%s1576_s4 + $0x68] sm:$0xff] }
 0x189   :  { %v435_v34 = vmax.f32 %v326_v33, 0.0  ;;  %1097 = vmatpush1.bf16.msra.mxu1 %v1096_v30  ;;  %v500_v30 = vld [vmem:[%s1576_s4 + $0x50] sm:$0xff]  ;;  %v505_v33 = vld [vmem:[%s1576_s4 + $0x78] sm:$0xff] }
 0x18a   :  { %1098 = vmatprep.subr.bf16.mxu1 %v1175_v3 }
 0x18b   :  { %v1099_v35 = vpack.c.bf16 %v436_v32, %v435_v34  ;;  %v1058_v36 = vpop.f32.mrb[12].mxu0  ;;  %v502_v32 = vld [vmem:[%s1576_s4 + $0x60] sm:$0xff]  ;;  %v504_v34 = vld [vmem:[%s1576_s4 + $0x70] sm:$0xff] }
 0x18c   :  { %v438_v37 = vmax.f32 %v1058_v36, 0.0  ;;  %v336_v38 = vpop.f32.mrb[13].mxu0  ;;  %v506_v36 = vld [vmem:[%s1576_s4 + $0x80] sm:$0xff] }
 0x18d   :  { %v437_v39 = vmax.f32 %v336_v38, 0.0  ;;  %1100 = vmatpush1.bf16.msra.mxu1 %v1099_v35  ;;  %v507_v35 = vld [vmem:[%s1576_s4 + $0x88] sm:$0xff]  ;;  %v508_v38 = vld [vmem:[%s1576_s4 + $0x90] sm:$0xff] }
 0x18e   :  { %1101 = vmatprep.subr.bf16.mxu1 %v1175_v3 }
 0x18f   :  { %v1102_v40 = vpack.c.bf16 %v438_v37, %v437_v39  ;;  %v1061_v41 = vpop.f32.mrb[14].mxu0  ;;  %v509_v37 = vld [vmem:[%s1576_s4 + $0x98] sm:$0xff]  ;;  %v511_v39 = vld [vmem:[%s1576_s4 + $0xa8] sm:$0xff] }
 0x190   :  { %v440_v42 = vmax.f32 %v1061_v41, 0.0  ;;  %v346_v43 = vpop.f32.mrb[15].mxu0  ;;  %v513_v41 = vld [vmem:[%s1576_s4 + $0xb8] sm:$0xff] }
 0x191   :  { %v439_v44 = vmax.f32 %v346_v43, 0.0  ;;  %1103 = vmatpush1.bf16.msra.mxu1 %v1102_v40  ;;  %v510_v40 = vld [vmem:[%s1576_s4 + $0xa0] sm:$0xff]  ;;  %v515_v43 = vld [vmem:[%s1576_s4 + $0xc8] sm:$0xff] }
 0x192   :  { %1104 = vmatprep.subr.bf16.mxu1 %v1175_v3 }
 0x193   :  { %v1105_v45 = vpack.c.bf16 %v440_v42, %v439_v44  ;;  %v1064_v46 = vpop.f32.mrb[16].mxu0  ;;  %v512_v42 = vld [vmem:[%s1576_s4 + $0xb0] sm:$0xff]  ;;  %v514_v44 = vld [vmem:[%s1576_s4 + $0xc0] sm:$0xff] }
 0x194   :  { %v442_v47 = vmax.f32 %v1064_v46, 0.0  ;;  %v356_v48 = vpop.f32.mrb[17].mxu0  ;;  %v516_v46 = vld [vmem:[%s1576_s4 + $0xd0] sm:$0xff] }
 0x195   :  { %v441_v49 = vmax.f32 %v356_v48, 0.0  ;;  %1106 = vmatpush1.bf16.msra.mxu1 %v1105_v45  ;;  %v517_v45 = vld [vmem:[%s1576_s4 + $0xd8] sm:$0xff]  ;;  %v518_v48 = vld [vmem:[%s1576_s4 + $0xe0] sm:$0xff] }
 0x196   :  { %1107 = vmatprep.subr.bf16.mxu1 %v1175_v3 }
 0x197   :  { %v1108_v50 = vpack.c.bf16 %v442_v47, %v441_v49  ;;  %v1067_v51 = vpop.f32.mrb[18].mxu0  ;;  %v519_v47 = vld [vmem:[%s1576_s4 + $0xe8] sm:$0xff]  ;;  %v521_v49 = vld [vmem:[%s1576_s4 + $0xf8] sm:$0xff] }
 0x198   :  { %v444_v52 = vmax.f32 %v1067_v51, 0.0  ;;  %v366_v53 = vpop.f32.mrb[19].mxu0  ;;  %v523_v51 = vld [vmem:[%s1576_s4 + $0x108] sm:$0xff] }
 0x199   :  { %v443_v54 = vmax.f32 %v366_v53, 0.0  ;;  %1109 = vmatpush1.bf16.msra.mxu1 %v1108_v50  ;;  %v520_v50 = vld [vmem:[%s1576_s4 + $0xf0] sm:$0xff]  ;;  %v525_v53 = vld [vmem:[%s1576_s4 + $0x118] sm:$0xff] }
 0x19a   :  { %1110 = vmatprep.subr.bf16.mxu1 %v1175_v3 }
 0x19b   :  { %v1111_v55 = vpack.c.bf16 %v444_v52, %v443_v54  ;;  %v1070_v56 = vpop.f32.mrb[20].mxu0  ;;  %v522_v52 = vld [vmem:[%s1576_s4 + $0x100] sm:$0xff]  ;;  %v524_v54 = vld [vmem:[%s1576_s4 + $0x110] sm:$0xff] }
 0x19c   :  { %v446_v57 = vmax.f32 %v1070_v56, 0.0  ;;  %v376_v58 = vpop.f32.mrb[21].mxu0  ;;  %v526_v56 = vld [vmem:[%s1576_s4 + $0x120] sm:$0xff] }
 0x19d   :  { %v445_v59 = vmax.f32 %v376_v58, 0.0  ;;  %1112 = vmatpush1.bf16.msra.mxu1 %v1111_v55  ;;  %v527_v55 = vld [vmem:[%s1576_s4 + $0x128] sm:$0xff]  ;;  %v528_v58 = vld [vmem:[%s1576_s4 + $0x130] sm:$0xff] }
 0x19e   :  { %1113 = vmatprep.subr.bf16.mxu1 %v1175_v3 }
 0x19f   :  { %v1114_v60 = vpack.c.bf16 %v446_v57, %v445_v59  ;;  %v1073_v61 = vpop.f32.mrb[22].mxu0  ;;  %v529_v57 = vld [vmem:[%s1576_s4 + $0x138] sm:$0xff]  ;;  %v531_v59 = vld [vmem:[%s1576_s4 + $0x148] sm:$0xff] }
 0x1a0   :  { %v448_v62 = vmax.f32 %v1073_v61, 0.0  ;;  %v386_v63 = vpop.f32.mrb[23].mxu0  ;;  %v533_v61 = vld [vmem:[%s1576_s4 + $0x158] sm:$0xff] }
 0x1a1   :  { %v447_v0 = vmax.f32 %v386_v63, 0.0  ;;  %1115 = vmatpush1.bf16.msra.mxu1 %v1114_v60  ;;  %v530_v60 = vld [vmem:[%s1576_s4 + $0x140] sm:$0xff]  ;;  %v535_v63 = vld [vmem:[%s1576_s4 + $0x168] sm:$0xf] }
 0x1a2   :  { %1116 = vmatprep.subr.bf16.mxu1 %v1175_v3 }
 0x1a3   :  { %v1117_v1 = vpack.c.bf16 %v448_v62, %v447_v0  ;;  %v1076_v2 = vpop.f32.mrb[24].mxu0  ;;  %v532_v62 = vld [vmem:[%s1576_s4 + $0x150] sm:$0xff]  ;;  %v534_v0 = vld [vmem:[%s1576_s4 + $0x160] sm:$0xf] }
 0x1a4   :  { %v450_v4 = vmax.f32 %v1076_v2, 0.0  ;;  %v396_v5 = vpop.f32.mrb[25].mxu0  ;;  %v845_v2 = vld [vmem:[%s1573_s6 + $0x8] sm:$0xf] }
 0x1a5   :  { %v449_v6 = vmax.f32 %v396_v5, 0.0  ;;  %1118 = vmatpush1.bf16.msra.mxu1 %v1117_v1  ;;  %v841_v1 = vld [vmem:[%s1577_s5 + $0x8] sm:$0xff]  ;;  %853 = vperm.xlu0 %1171, %v845_v2  }
 0x1a6   :  { %1119 = vmatprep.subr.bf16.mxu1 %v1175_v3  ;;  %1002 = vmatprep.mubr.msk.f32.mxu0 %vm856_vm5, %v841_v1 }
 0x1a7   :  { %v1120_v7 = vpack.c.bf16 %v450_v4, %v449_v6  ;;  %v1079_v9 = vpop.f32.mrb[26].mxu0 }
 0x1a8   :  { %v452_v10 = vmax.f32 %v1079_v9, 0.0  ;;  %v406_v11 = vpop.f32.mrb[27].mxu0 }
 0x1a9   :  { %v451_v12 = vmax.f32 %v406_v11, 0.0  ;;  %1121 = vmatpush1.bf16.msra.mxu1 %v1120_v7 }
 0x1aa   :  { %1122 = vmatprep.subr.bf16.mxu1 %v1175_v3 }
 0x1ab   :  { %v1123_v13 = vpack.c.bf16 %v452_v10, %v451_v12  ;;  %v1082_v14 = vpop.f32.mrb[28].mxu0 }
 0x1ac   :  { %v454_v15 = vmax.f32 %v1082_v14, 0.0  ;;  %v416_v16 = vpop.f32.mrb[29].mxu0 }
 0x1ad   :  { %v453_v17 = vmax.f32 %v416_v16, 0.0  ;;  %1124 = vmatpush1.bf16.msra.mxu1 %v1123_v13 }
 0x1ae   :  { %1125 = vmatprep.subr.bf16.mxu1 %v1175_v3 }
 0x1af   :  { %v1126_v18 = vpack.c.bf16 %v454_v15, %v453_v17 }
 0x1b1   :  { %1127 = vmatpush1.bf16.msra.mxu1 %v1126_v18 }
 0x1b2   :  { %697 = vmatprep.subr.mxu1 %v1176_v19 }
 0x1b5   :  { %1004 = vmatpush1.msk.msra.mxu1 %vm487_vm4, %v1177_v22 }
 0x1b6   :  { %702 = vmatmul.mubr.f32.vlgmr.msra.gmra.mrb[0].mxu1 %v490_v20 }
 0x1b7   :  { %979 = vmatprep.mubr.msk.f32.mxu1 %vm567_vm3, %v493_v21 }
 0x1ba   :  { %707 = vmatmul.mubr.f32.gmra.mrb[2].mxu1 %v492_v23 }
 0x1bb   :  { %980 = vmatprep.mubr.msk.f32.mxu1 %vm567_vm3, %v495_v8 }
 0x1be   :  { %712 = vmatmul.mubr.f32.gmra.mrb[4].mxu1 %v494_v24 }
 0x1bf   :  { %981 = vmatprep.mubr.msk.f32.mxu1 %vm567_vm3, %v497_v25 }
 0x1c2   :  { %717 = vmatmul.mubr.f32.gmra.mrb[6].mxu1 %v496_v26 }
 0x1c3   :  { %982 = vmatprep.mubr.msk.f32.mxu1 %vm567_vm3, %v499_v27 }
 0x1c6   :  { %722 = vmatmul.mubr.f32.gmra.mrb[8].mxu1 %v498_v28 }
 0x1c7   :  { %983 = vmatprep.mubr.msk.f32.mxu1 %vm567_vm3, %v501_v29 }
 0x1ca   :  { %727 = vmatmul.mubr.f32.gmra.mrb[10].mxu1 %v500_v30 }
 0x1cb   :  { %984 = vmatprep.mubr.msk.f32.mxu1 %vm567_vm3, %v503_v31 }
 0x1ce   :  { %732 = vmatmul.mubr.f32.gmra.mrb[12].mxu1 %v502_v32 }
 0x1cf   :  { %985 = vmatprep.mubr.msk.f32.mxu1 %vm567_vm3, %v505_v33 }
 0x1d2   :  { %737 = vmatmul.mubr.f32.gmra.mrb[14].mxu1 %v504_v34 }
 0x1d3   :  { %986 = vmatprep.mubr.msk.f32.mxu1 %vm567_vm3, %v507_v35 }
 0x1d6   :  { %742 = vmatmul.mubr.f32.gmra.mrb[16].mxu1 %v506_v36 }
 0x1d7   :  { %987 = vmatprep.mubr.msk.f32.mxu1 %vm567_vm3, %v509_v37 }
 0x1da   :  { %747 = vmatmul.mubr.f32.gmra.mrb[18].mxu1 %v508_v38 }
 0x1db   :  { %988 = vmatprep.mubr.msk.f32.mxu1 %vm567_vm3, %v511_v39 }
 0x1de   :  { %752 = vmatmul.mubr.f32.gmra.mrb[20].mxu1 %v510_v40 }
 0x1df   :  { %989 = vmatprep.mubr.msk.f32.mxu1 %vm567_vm3, %v513_v41 }
 0x1e2   :  { %757 = vmatmul.mubr.f32.gmra.mrb[22].mxu1 %v512_v42 }
 0x1e3   :  { %990 = vmatprep.mubr.msk.f32.mxu1 %vm567_vm3, %v515_v43 }
 0x1e6   :  { %762 = vmatmul.mubr.f32.gmra.mrb[24].mxu1 %v514_v44 }
 0x1e7   :  { %991 = vmatprep.mubr.msk.f32.mxu1 %vm567_vm3, %v517_v45 }
 0x1ea   :  { %767 = vmatmul.mubr.f32.gmra.mrb[26].mxu1 %v516_v46 }
 0x1eb   :  { %992 = vmatprep.mubr.msk.f32.mxu1 %vm567_vm3, %v519_v47 }
 0x1ee   :  { %772 = vmatmul.mubr.f32.gmra.mrb[28].mxu1 %v518_v48 }
 0x1ef   :  { %993 = vmatprep.mubr.msk.f32.mxu1 %vm567_vm3, %v521_v49 }
 0x1f2   :  { %777 = vmatmul.mubr.f32.gmra.mrb[30].mxu1 %v520_v50 }
 0x1f3   :  { %994 = vmatprep.mubr.msk.f32.mxu1 %vm567_vm3, %v523_v51 }
 0x1f6   :  { %782 = vmatmul.mubr.f32.gmra.mrb[32].mxu1 %v522_v52 }
 0x1f7   :  { %995 = vmatprep.mubr.msk.f32.mxu1 %vm567_vm3, %v525_v53 }
 0x1fa   :  { %787 = vmatmul.mubr.f32.gmra.mrb[34].mxu1 %v524_v54 }
 0x1fb   :  { %996 = vmatprep.mubr.msk.f32.mxu1 %vm567_vm3, %v527_v55 }
 0x1fe   :  { %792 = vmatmul.mubr.f32.gmra.mrb[36].mxu1 %v526_v56 }
 0x1ff   :  { %997 = vmatprep.mubr.msk.f32.mxu1 %vm567_vm3, %v529_v57 }
 0x202   :  { %797 = vmatmul.mubr.f32.gmra.mrb[38].mxu1 %v528_v58 }
 0x203   :  { %998 = vmatprep.mubr.msk.f32.mxu1 %vm567_vm3, %v531_v59 }
 0x206   :  { %802 = vmatmul.mubr.f32.gmra.mrb[40].mxu1 %v530_v60 }
 0x207   :  { %999 = vmatprep.mubr.msk.f32.mxu1 %vm567_vm3, %v533_v61 }
 0x20a   :  { %807 = vmatmul.mubr.f32.gmra.mrb[42].mxu1 %v532_v62 }
 0x20b   :  { %1000 = vmatprep.mubr.msk.f32.mxu1 %vm567_vm3, %v535_v63 }
 0x20e   :  { %812 = vmatmul.mubr.f32.gmra.mrb[44].mxu1 %v534_v0 }
 0x289   :  { %v703_v4 = vpop.f32.mrb[0].mxu1 }
 0x28a   :  { %v705_v5 = vpop.f32.mrb[1].mxu1  ;;  %v817_v7 = vmax.f32 %v703_v4, 0.0 }
 0x28d   :  { %v708_v6 = vpop.f32.mrb[2].mxu1 }
 0x28e   :  { %v818_v9 = vmax.f32 %v708_v6, 0.0  ;;  %v710_v10 = vpop.f32.mrb[3].mxu1 }
 0x290   :  { %v1129_v11 = vpack.c.bf16 %v818_v9, %v817_v7 }
 0x291   :  { %v713_v12 = vpop.f32.mrb[4].mxu1 }
 0x292   :  { %v715_v13 = vpop.f32.mrb[5].mxu1  ;;  %1130 = vmatpush1.bf16.msra.mxu0 %v1129_v11  ;;  %v819_v15 = vmax.f32 %v713_v12, 0.0 }
 0x293   :  { %1131 = vmatprep.subr.bf16.mxu0 %v1175_v3 }
 0x295   :  { %v718_v14 = vpop.f32.mrb[6].mxu1 }
 0x296   :  { %v820_v16 = vmax.f32 %v718_v14, 0.0  ;;  %v720_v17 = vpop.f32.mrb[7].mxu1 }
 0x298   :  { %v1132_v18 = vpack.c.bf16 %v820_v16, %v819_v15 }
 0x299   :  { %v723_v20 = vpop.f32.mrb[8].mxu1 }
 0x29a   :  { %v725_v21 = vpop.f32.mrb[9].mxu1  ;;  %1133 = vmatpush1.bf16.msra.mxu0 %v1132_v18  ;;  %v821_v23 = vmax.f32 %v723_v20, 0.0 }
 0x29b   :  { %1134 = vmatprep.subr.bf16.mxu0 %v1175_v3 }
 0x29d   :  { %v728_v22 = vpop.f32.mrb[10].mxu1 }
 0x29e   :  { %v822_v8 = vmax.f32 %v728_v22, 0.0  ;;  %v730_v24 = vpop.f32.mrb[11].mxu1 }
 0x29f   :  { %v843_v24 = vld [vmem:[%s1577_s5 + $0x18] sm:$0xf] }
 0x2a0   :  { %v1135_v25 = vpack.c.bf16 %v822_v8, %v821_v23  ;;  %v840_v8 = vld [vmem:[%s1577_s5] sm:$0xff] }
 0x2a1   :  { %v733_v26 = vpop.f32.mrb[12].mxu1 }
 0x2a2   :  { %v735_v27 = vpop.f32.mrb[13].mxu1  ;;  %1136 = vmatpush1.bf16.msra.mxu0 %v1135_v25  ;;  %v823_v29 = vmax.f32 %v733_v26, 0.0  ;;  %v849_v25 = vpop.permute.xlu1 %848 }
 0x2a3   :  { %1137 = vmatprep.subr.bf16.mxu0 %v1175_v3 }
 0x2a5   :  { %v738_v28 = vpop.f32.mrb[14].mxu1 }
 0x2a6   :  { %v824_v30 = vmax.f32 %v738_v28, 0.0  ;;  %v740_v31 = vpop.f32.mrb[15].mxu1  ;;  %v854_v28 = vpop.permute.xlu0 %853 }
 0x2a8   :  { %v1138_v32 = vpack.c.bf16 %v824_v30, %v823_v29 }
 0x2a9   :  { %v743_v33 = vpop.f32.mrb[16].mxu1 }
 0x2aa   :  { %v745_v34 = vpop.f32.mrb[17].mxu1  ;;  %1139 = vmatpush1.bf16.msra.mxu0 %v1138_v32  ;;  %v825_v36 = vmax.f32 %v743_v33, 0.0 }
 0x2ab   :  { %1140 = vmatprep.subr.bf16.mxu0 %v1175_v3 }
 0x2ad   :  { %v748_v35 = vpop.f32.mrb[18].mxu1 }
 0x2ae   :  { %v826_v37 = vmax.f32 %v748_v35, 0.0  ;;  %v750_v38 = vpop.f32.mrb[19].mxu1 }
 0x2b0   :  { %v1141_v39 = vpack.c.bf16 %v826_v37, %v825_v36 }
 0x2b1   :  { %v753_v40 = vpop.f32.mrb[20].mxu1 }
 0x2b2   :  { %v755_v41 = vpop.f32.mrb[21].mxu1  ;;  %1142 = vmatpush1.bf16.msra.mxu0 %v1141_v39  ;;  %v827_v43 = vmax.f32 %v753_v40, 0.0 }
 0x2b3   :  { %1143 = vmatprep.subr.bf16.mxu0 %v1175_v3 }
 0x2b5   :  { %v758_v42 = vpop.f32.mrb[22].mxu1 }
 0x2b6   :  { %v828_v44 = vmax.f32 %v758_v42, 0.0  ;;  %v760_v45 = vpop.f32.mrb[23].mxu1 }
 0x2b8   :  { %v1144_v46 = vpack.c.bf16 %v828_v44, %v827_v43 }
 0x2b9   :  { %v763_v47 = vpop.f32.mrb[24].mxu1 }
 0x2ba   :  { %v765_v48 = vpop.f32.mrb[25].mxu1  ;;  %1145 = vmatpush1.bf16.msra.mxu0 %v1144_v46  ;;  %v829_v50 = vmax.f32 %v763_v47, 0.0 }
 0x2bb   :  { %1146 = vmatprep.subr.bf16.mxu0 %v1175_v3 }
 0x2bd   :  { %v768_v49 = vpop.f32.mrb[26].mxu1 }
 0x2be   :  { %v830_v51 = vmax.f32 %v768_v49, 0.0  ;;  %v770_v52 = vpop.f32.mrb[27].mxu1 }
 0x2c0   :  { %v1147_v53 = vpack.c.bf16 %v830_v51, %v829_v50 }
 0x2c1   :  { %v773_v54 = vpop.f32.mrb[28].mxu1 }
 0x2c2   :  { %v775_v55 = vpop.f32.mrb[29].mxu1  ;;  %1148 = vmatpush1.bf16.msra.mxu0 %v1147_v53  ;;  %v831_v57 = vmax.f32 %v773_v54, 0.0 }
 0x2c3   :  { %1149 = vmatprep.subr.bf16.mxu0 %v1175_v3 }
 0x2c5   :  { %v778_v56 = vpop.f32.mrb[30].mxu1 }
 0x2c6   :  { %v832_v58 = vmax.f32 %v778_v56, 0.0  ;;  %v780_v59 = vpop.f32.mrb[31].mxu1 }
 0x2c8   :  { %v1150_v60 = vpack.c.bf16 %v832_v58, %v831_v57 }
 0x2c9   :  { %v783_v61 = vpop.f32.mrb[32].mxu1 }
 0x2ca   :  { %v785_v62 = vpop.f32.mrb[33].mxu1  ;;  %1151 = vmatpush1.bf16.msra.mxu0 %v1150_v60  ;;  %v833_v0 = vmax.f32 %v783_v61, 0.0 }
 0x2cb   :  { %1152 = vmatprep.subr.bf16.mxu0 %v1175_v3 }
 0x2cd   :  { %v788_v63 = vpop.f32.mrb[34].mxu1 }
 0x2ce   :  { %v834_v1 = vmax.f32 %v788_v63, 0.0  ;;  %v790_v2 = vpop.f32.mrb[35].mxu1 }
 0x2d0   :  { %v1153_v4 = vpack.c.bf16 %v834_v1, %v833_v0 }
 0x2d1   :  { %v793_v5 = vpop.f32.mrb[36].mxu1 }
 0x2d2   :  { %v795_v6 = vpop.f32.mrb[37].mxu1  ;;  %1154 = vmatpush1.bf16.msra.mxu0 %v1153_v4  ;;  %v835_v9 = vmax.f32 %v793_v5, 0.0 }
 0x2d3   :  { %1155 = vmatprep.subr.bf16.mxu0 %v1175_v3 }
 0x2d5   :  { %v798_v7 = vpop.f32.mrb[38].mxu1 }
 0x2d6   :  { %v836_v10 = vmax.f32 %v798_v7, 0.0  ;;  %v800_v11 = vpop.f32.mrb[39].mxu1 }
 0x2d8   :  { %v1156_v12 = vpack.c.bf16 %v836_v10, %v835_v9 }
 0x2d9   :  { %v803_v13 = vpop.f32.mrb[40].mxu1 }
 0x2da   :  { %v805_v14 = vpop.f32.mrb[41].mxu1  ;;  %1157 = vmatpush1.bf16.msra.mxu0 %v1156_v12  ;;  %v837_v16 = vmax.f32 %v803_v13, 0.0 }
 0x2db   :  { %1158 = vmatprep.subr.bf16.mxu0 %v1175_v3  ;;  %v842_v3 = vld [vmem:[%s1577_s5 + $0x10] sm:$0xf] }
 0x2dd   :  { %v808_v15 = vpop.f32.mrb[42].mxu1 }
 0x2de   :  { %v838_v17 = vmax.f32 %v808_v15, 0.0  ;;  %v810_v18 = vpop.f32.mrb[43].mxu1 }
 0x2e0   :  { %v1159_v20 = vpack.c.bf16 %v838_v17, %v837_v16 }
 0x2e1   :  { %v813_v21 = vpop.f32.mrb[44].mxu1 }
 0x2e2   :  { %1160 = vmatpush1.bf16.msra.mxu0 %v1159_v20  ;;  %v839_v22 = vmax.f32 %v813_v21, 0.0  ;;  %v815_v23 = vpop.f32.mrb[45].mxu1 }
 0x2e3   :  { %910 = vmatprep.subr.mxu0 %v1176_v19 }
 0x2e6   :  { %1001 = vmatpush1.msk.msra.mxu0 %vm87_vm2, %v839_v22 }
 0x2e7   :  { %931 = vmatmul.mubr.f32.vlgmr.msra.gmra.mrb[30].mxu0 %v840_v8 }
 0x2e8   :  { %1003 = vmatprep.mubr.msk.f32.mxu0 %vm856_vm5, %v843_v24 }
 0x2eb   :  { %936 = vmatmul.mubr.f32.gmra.mrb[32].mxu0 %v842_v3 }
 0x3ba   :  { %v932_v19 = vpop.f32.mrb[30].mxu0 }
 0x3bb   :  { %v933_v26 = vadd.f32 %v932_v19, %v849_v25  ;;  %v934_v27 = vpop.f32.mrb[31].mxu0 }
 0x3bd   :  { %941 = vst [vmem:[%s1578_s7] sm:$0xff] %v933_v26 }
 0x3be   :  { %v937_v29 = vpop.f32.mrb[32].mxu0 }
 0x3bf   :  { %v938_v30 = vadd.f32 %v937_v29, %v854_v28  ;;  %v939_v31 = vpop.f32.mrb[33].mxu0 }
 0x3c1   :  { %942 = vst [vmem:[%s1578_s7 + $0x8] sm:$0xf] %v938_v30 }

</bundles_post_ra>
